<compile_context>
chip_gen: v6e
topology: v6e:2x2x1
jax: 0.10.0
libtpu: 0.0.40
codegen_flags: <defaults>
</compile_context>

<pallas_src>
import functools

import jax
import jax.numpy as jnp
from jax.experimental import pallas as pl
from jax.experimental.pallas import tpu as pltpu


def _cnn_kernel(y_ref, wcol_ref, bconv_ref, mask_ref, wlin_ref, blin_ref,
                out_ref, *, tanh_in_bf16):
    """One grid step = one batch tile: tanh -> fused im2col conv -> ReLU ->
    masked max-over-time -> linear -> sigmoid, stored as a lane-dense row."""
    bt, L, D = y_ref.shape
    KD, GFp = wcol_ref.shape
    Rmax = KD // D

    x = y_ref[...]                                    # (bt, L, D) f32
    if tanh_in_bf16:                                  # static, chip-dependent
        x = x.astype(jnp.bfloat16)                    # bf16 VPU/EUP (v6e/v7x)
    y = jnp.tanh(x).astype(jnp.bfloat16)              # (bt, L, D) bf16

    # Zero time-padding in-kernel (replaces the wrapper-side jnp.pad); padded
    # rows only ever meet zero-padded weight columns or masked positions.
    if Rmax > 1:
        y = jnp.concatenate(
            [y, jnp.zeros((bt, Rmax - 1, D), y.dtype)], axis=1)  # (bt, Lp, D)

    # bf16 im2col: cols[b, t, j*D + d] = y[b, t + j, d] -> all G conv banks in
    # ONE K = Rmax*D MXU contraction (f32 accumulation).
    cols = jnp.concatenate([y[:, j:j + L, :] for j in range(Rmax)], axis=-1)
    cols = cols.reshape(bt * L, KD)                   # bf16 MXU operand

    s = jnp.dot(cols, wcol_ref[...], preferred_element_type=jnp.float32)
    s = s.reshape(bt, L, GFp)                         # col index = g*F + f (padded)

    s = jnp.maximum(s + bconv_ref[...], 0.0)          # conv bias + ReLU
    s = s * mask_ref[...]                             # ReLU>=0: zeroing invalid
                                                      # positions is max-safe
    pooled = jnp.max(s, axis=1)                       # (bt, GFp) max-over-time

    # Final linear as (1, GFp) @ (GFp, bt): result is already a lane-dense
    # (1, bt) row; zero-padded feature columns contribute 0.
    logit = jnp.dot(wlin_ref[...], pooled.T,
                    preferred_element_type=jnp.float32) + blin_ref[0]
    out_ref[...] = jax.nn.sigmoid(logit).reshape(1, 1, bt)


def _device_kind():
    try:
        return jax.devices()[0].device_kind.lower()
    except Exception:
        return ""


def _chip_config():
    """(batch-buffer VMEM budget, explicit scoped-VMEM limit, target grid
    steps, run tanh in bf16)."""
    kind = _device_kind()
    if "v7" in kind or "7x" in kind:     # 64 MiB VMEM, 2 TensorCores
        return 16 << 20, 48 << 20, 2, True
    if "v5" in kind:                     # no bf16 VPU/EUP; small default scoped limit
        return 12 << 20, 64 << 20, 2, False
    if "v6" in kind:
        return 24 << 20, 64 << 20, 4, True
    return 16 << 20, 48 << 20, 2, False  # unknown chip: conservative defaults


def _pick_batch_tile(B, L, D, Rmax, GFp, budget_bytes, target_steps):
    """Pick the batch tile from the *live* per-sample VMEM footprint (double-
    buffered f32 input + bf16 tanh/im2col intermediates + f32 matmul chain),
    aiming for >= target_steps grid steps at large B.  The wrapper pads B up
    to bt * n_steps (inert rows) instead of ignoring the budget."""
    per_sample = (2 * L * D * 4                      # double-buffered f32 input block
                  + 2 * (L + Rmax) * D * 2           # bf16 tanh result + padded copy
                  + L * Rmax * D * 2                 # bf16 im2col matrix
                  + L * GFp * 4)                     # f32 conv/ReLU/mask chain
    fixed = 2 * (Rmax * D * GFp * 2 + L * GFp * 4 + 3 * GFp * 4)  # weights/mask/bias
    bt = max(1, min(B, (budget_bytes - fixed) // per_sample))
    if B // bt < target_steps and B >= 8 * target_steps:
        bt = (B + target_steps - 1) // target_steps  # megacore / DMA-compute overlap
    if bt >= 8:
        bt -= bt % 8                                 # sublane-friendly tiles
    bt = max(1, min(bt, B))
    n_steps = (B + bt - 1) // bt
    return bt, n_steps


def cnn_forward(tokens, emb_table, conv_ws, conv_bs, lin_w, lin_b, region_sizes):
    B, L = tokens.shape
    D = emb_table.shape[1]
    F = conv_ws[0].shape[0]
    G = len(region_sizes)
    Rmax = max(region_sizes)
    GF = G * F
    GFp = -(-GF // 128) * 128            # pad feature axis to full 128-lane vregs
    KD = Rmax * D

    budget, vmem_limit, target_steps, tanh_bf16 = _chip_config()
    bt, n_steps = _pick_batch_tile(B, L, D, Rmax, GFp, budget, target_steps)
    Bp = bt * n_steps

    # Embedding lookup (gather) stays as XLA glue; tanh/conv/ReLU/pool/linear/
    # sigmoid are fused in the kernel (time-padding now happens in-kernel).
    # TODO(synk): fuse the embedding row-gather itself (scalar-prefetch tokens
    # + DMA gather from HBM) to drop the remaining activation HBM round-trip.
    y_emb = emb_table[tokens].astype(jnp.float32)                  # (B, L, D)
    if Bp != B:
        y_emb = jnp.pad(y_emb, ((0, Bp - B), (0, 0), (0, 0)))      # inert rows

    # im2col-packed conv weights: W[j*D + d, g*F + f] = conv_ws[g][f, 0, j, d],
    # zero beyond each region size and zero in the padded feature columns.
    wcols = []
    for w in conv_ws:
        r = w.shape[2]
        wp = jnp.pad(w[:, 0], ((0, 0), (0, Rmax - r), (0, 0)))     # (F, Rmax, D)
        wcols.append(jnp.transpose(wp, (1, 2, 0)).reshape(KD, F))
    wcol = jnp.concatenate(wcols, axis=1)                          # (KD, GF)
    wcol = jnp.pad(wcol, ((0, 0), (0, GFp - GF))).astype(jnp.bfloat16)

    bconv = jnp.pad(jnp.concatenate(conv_bs, axis=0),
                    (0, GFp - GF)).reshape(1, GFp).astype(jnp.float32)

    # Validity mask over conv-output positions (valid iff t <= L - r_g).
    pos = jnp.arange(L)
    mask = jnp.concatenate(
        [jnp.broadcast_to((pos <= L - r).astype(jnp.float32)[:, None], (L, F))
         for r in region_sizes], axis=1)                           # (L, GF)
    mask = jnp.pad(mask, ((0, 0), (0, GFp - GF)))                  # (L, GFp)

    # torch: cat(dim=-1) then flatten(1) => flattened index f*G + g; permute
    # the linear weights into the kernel's pooled g*F + f layout, zero-pad.
    wlin = lin_w[0].reshape(F, G).T.reshape(1, GF)
    wlin = jnp.pad(wlin, ((0, 0), (0, GFp - GF))).astype(jnp.float32)
    blin = lin_b.astype(jnp.float32)                               # (1,)

    # TODO(synk): nn.Dropout is identity in eval mode; training-mode dropout
    # (RNG mask on the pooled features) is not implemented.
    out = pl.pallas_call(
        functools.partial(_cnn_kernel, tanh_in_bf16=tanh_bf16),
        out_shape=jax.ShapeDtypeStruct((n_steps, 1, bt), jnp.float32),
        grid=(n_steps,),
        in_specs=[
            pl.BlockSpec((bt, L, D), lambda b: (b, 0, 0)),
            pl.BlockSpec((KD, GFp), lambda b: (0, 0)),
            pl.BlockSpec((1, GFp), lambda b: (0, 0)),
            pl.BlockSpec((L, GFp), lambda b: (0, 0)),
            pl.BlockSpec((1, GFp), lambda b: (0, 0)),
            pl.BlockSpec(memory_space=pltpu.MemorySpace.SMEM),
        ],
        out_specs=pl.BlockSpec((1, 1, bt), lambda b: (b, 0, 0)),
        compiler_params=pltpu.CompilerParams(
            dimension_semantics=("parallel",),
            vmem_limit_bytes=vmem_limit),
    )(y_emb, wcol, bconv, mask, wlin, blin)

    return out.reshape(Bp, 1)[:B]                                  # back to (B, 1)


def reference_forward(tokens, emb_table, conv_ws, conv_bs, lin_w, lin_b, region_sizes):
    """Pure-JAX f32 reference matching the PyTorch forward semantics."""
    y = jnp.tanh(emb_table[tokens])                  # (B, L, D)
    B, L, _ = y.shape
    pools = []
    for r, w, b in zip(region_sizes, conv_ws, conv_bs):
        Lout = L - r + 1
        cols = jnp.stack([y[:, t:t + r, :] for t in range(Lout)], axis=1)  # (B,Lout,r,D)
        s = jnp.einsum('btrd,frd->btf', cols, w[:, 0]) + b[None, None, :]
        s = jax.nn.relu(s)
        pools.append(jnp.max(s, axis=1))             # (B, F)
    feat = jnp.stack(pools, axis=-1).reshape(B, -1)  # (B, F*G), index f*G + g
    logit = feat @ lin_w.T + lin_b
    return jax.nn.sigmoid(logit)


if __name__ == "__main__":
    B, L, D, F = 2, 16, 32, 8
    vocab = 50
    region_sizes = [2, 3, 4]
    G = len(region_sizes)

    key = jax.random.PRNGKey(0)
    keys = jax.random.split(key, 4 + 2 * G)
    tokens = jax.random.randint(keys[0], (B, L), 0, vocab, dtype=jnp.int32)
    emb_table = 0.5 * jax.random.normal(keys[1], (vocab, D), jnp.float32)
    conv_ws, conv_bs = [], []
    for i, r in enumerate(region_sizes):
        conv_ws.append(0.2 * jax.random.normal(keys[2 + 2 * i], (F, 1, r, D), jnp.float32))
        conv_bs.append(0.1 * jax.random.normal(keys[3 + 2 * i], (F,), jnp.float32))
    lin_w = 0.3 * jax.random.normal(keys[2 + 2 * G], (1, F * G), jnp.float32)
    lin_b = 0.1 * jax.random.normal(keys[3 + 2 * G], (1,), jnp.float32)

    out = jax.block_until_ready(
        cnn_forward(tokens, emb_table, conv_ws, conv_bs, lin_w, lin_b, region_sizes))
    ref = reference_forward(tokens, emb_table, conv_ws, conv_bs, lin_w, lin_b, region_sizes)

    assert out.shape == (B, 1), out.shape
    # bf16 MXU operands and (on v6e/v7x) bf16 tanh, vs f32 reference ->
    # slightly looser tolerance on the post-sigmoid output; layout/permutation
    # bugs would still show up as O(0.1-1) errors.
    assert jnp.allclose(out, ref, atol=2e-2, rtol=2e-2), (out, ref)
    print("KERNEL_OK")
</pallas_src>

<mosaic_0001>
module attributes {stable_mosaic.version = 11 : i64} {
  func.func @_cnn_kernel(%arg0: i32, %arg1: memref<2x16x32xf32, #tpu.memory_space<vmem>>, %arg2: memref<128x128xbf16, #tpu.memory_space<vmem>>, %arg3: memref<1x128xf32, #tpu.memory_space<vmem>>, %arg4: memref<16x128xf32, #tpu.memory_space<vmem>>, %arg5: memref<1x128xf32, #tpu.memory_space<vmem>>, %arg6: memref<1xf32, #tpu.memory_space<smem>>, %arg7: memref<1x1x2xf32, #tpu.memory_space<vmem>>) attributes {dimension_semantics = [#tpu.dimension_semantics<parallel>], iteration_bounds = array<i64: 1>, scalar_prefetch = 0 : i64, scratch_operands = 0 : i64, tpu.core_type = #tpu.core_type<tc>, window_params = [{transform_indices = @transform_0, window_bounds = array<i64: 2, 16, 32>}, {pipeline_mode = #tpu.pipeline_mode<synchronous>, transform_indices = @transform_1, window_bounds = array<i64: 128, 128>}, {pipeline_mode = #tpu.pipeline_mode<synchronous>, transform_indices = @transform_2, window_bounds = array<i64: 1, 128>}, {pipeline_mode = #tpu.pipeline_mode<synchronous>, transform_indices = @transform_3, window_bounds = array<i64: 16, 128>}, {pipeline_mode = #tpu.pipeline_mode<synchronous>, transform_indices = @transform_4, window_bounds = array<i64: 1, 128>}, {transform_indices = @transform_5, window_bounds = array<i64: 1>}, {transform_indices = @transform_6, window_bounds = array<i64: 1, 1, 2>}]} {
    %c0 = arith.constant 0 : index
    %c0_0 = arith.constant 0 : index
    %c0_1 = arith.constant 0 : index
    %0 = vector.load %arg1[%c0, %c0_0, %c0_1] : memref<2x16x32xf32, #tpu.memory_space<vmem>>, vector<2x16x32xf32>
    %1 = math.tanh %0 : vector<2x16x32xf32>
    %2 = arith.truncf %1 : vector<2x16x32xf32> to vector<2x16x32xbf16>
    %cst = arith.constant 0.000000e+00 : bf16
    %3 = vector.broadcast %cst : bf16 to vector<2x3x32xbf16>
    %4 = tpu.concatenate %2, %3 in 1 : vector<2x16x32xbf16>, vector<2x3x32xbf16> -> vector<2x19x32xbf16>
    %5 = vector.extract_strided_slice %4 {offsets = [0, 0, 0], sizes = [2, 16, 32], strides = [1, 1, 1]} : vector<2x19x32xbf16> to vector<2x16x32xbf16>
    %6 = vector.extract_strided_slice %4 {offsets = [0, 1, 0], sizes = [2, 16, 32], strides = [1, 1, 1]} : vector<2x19x32xbf16> to vector<2x16x32xbf16>
    %7 = vector.extract_strided_slice %4 {offsets = [0, 2, 0], sizes = [2, 16, 32], strides = [1, 1, 1]} : vector<2x19x32xbf16> to vector<2x16x32xbf16>
    %8 = vector.extract_strided_slice %4 {offsets = [0, 3, 0], sizes = [2, 16, 32], strides = [1, 1, 1]} : vector<2x19x32xbf16> to vector<2x16x32xbf16>
    %9 = tpu.concatenate %5, %6, %7, %8 in 2 : vector<2x16x32xbf16>, vector<2x16x32xbf16>, vector<2x16x32xbf16>, vector<2x16x32xbf16> -> vector<2x16x128xbf16>
    %10 = vector.shape_cast %9 : vector<2x16x128xbf16> to vector<32x128xbf16>
    %c0_2 = arith.constant 0 : index
    %c0_3 = arith.constant 0 : index
    %11 = vector.load %arg2[%c0_2, %c0_3] : memref<128x128xbf16, #tpu.memory_space<vmem>>, vector<128x128xbf16>
    %cst_4 = arith.constant dense<0.000000e+00> : vector<32x128xf32>
    %12 = tpu.matmul %10, %11, %cst_4 {dimension_numbers = #tpu.dot_dimension_numbers<[1], [0], [0], [1], [0, 0, 1, 1], [], []>} : vector<32x128xbf16>, vector<128x128xbf16>, vector<32x128xf32> -> vector<32x128xf32>
    %13 = vector.shape_cast %12 : vector<32x128xf32> to vector<2x16x128xf32>
    %c0_5 = arith.constant 0 : index
    %c0_6 = arith.constant 0 : index
    %14 = vector.load %arg3[%c0_5, %c0_6] : memref<1x128xf32, #tpu.memory_space<vmem>>, vector<1x128xf32>
    %15 = vector.shape_cast %14 : vector<1x128xf32> to vector<1x1x128xf32>
    %16 = vector.broadcast %15 : vector<1x1x128xf32> to vector<2x16x128xf32>
    %17 = arith.addf %13, %16 : vector<2x16x128xf32>
    %cst_7 = arith.constant 0.000000e+00 : f32
    %18 = vector.broadcast %cst_7 : f32 to vector<2x16x128xf32>
    %19 = arith.maximumf %17, %18 : vector<2x16x128xf32>
    %c0_8 = arith.constant 0 : index
    %c0_9 = arith.constant 0 : index
    %20 = vector.load %arg4[%c0_8, %c0_9] : memref<16x128xf32, #tpu.memory_space<vmem>>, vector<16x128xf32>
    %21 = vector.shape_cast %20 : vector<16x128xf32> to vector<1x16x128xf32>
    %22 = vector.broadcast %21 : vector<1x16x128xf32> to vector<2x16x128xf32>
    %23 = arith.mulf %19, %22 : vector<2x16x128xf32>
    %cst_10 = arith.constant dense<0xFF800000> : vector<2x128xf32>
    %24 = vector.multi_reduction <maximumf>, %23, %cst_10 [1] : vector<2x16x128xf32> to vector<2x128xf32>
    %c0_11 = arith.constant 0 : index
    %c0_12 = arith.constant 0 : index
    %25 = vector.load %arg5[%c0_11, %c0_12] : memref<1x128xf32, #tpu.memory_space<vmem>>, vector<1x128xf32>
    %26 = tpu.transpose %24, [1, 0] : vector<2x128xf32> -> vector<128x2xf32>
    %cst_13 = arith.constant dense<0.000000e+00> : vector<1x2xf32>
    %27 = tpu.matmul %25, %26, %cst_13 {dimension_numbers = #tpu.dot_dimension_numbers<[1], [0], [0], [1], [0, 0, 1, 1], [], []>} : vector<1x128xf32>, vector<128x2xf32>, vector<1x2xf32> -> vector<1x2xf32>
    %c0_14 = arith.constant 0 : index
    %28 = memref.load %arg6[%c0_14] : memref<1xf32, #tpu.memory_space<smem>>
    %29 = vector.broadcast %28 : f32 to vector<1x2xf32>
    %30 = arith.addf %27, %29 : vector<1x2xf32>
    %31 = arith.negf %30 : vector<1x2xf32>
    %32 = math.exp %31 : vector<1x2xf32>
    %cst_15 = arith.constant 1.000000e+00 : f32
    %33 = vector.broadcast %cst_15 : f32 to vector<1x2xf32>
    %34 = arith.addf %33, %32 : vector<1x2xf32>
    %35 = arith.divf %33, %34 : vector<1x2xf32>
    %36 = vector.shape_cast %35 : vector<1x2xf32> to vector<1x1x2xf32>
    %c0_16 = arith.constant 0 : index
    %c0_17 = arith.constant 0 : index
    %c0_18 = arith.constant 0 : index
    %37 = vector.load %arg7[%c0_16, %c0_17, %c0_18] : memref<1x1x2xf32, #tpu.memory_space<vmem>>, vector<1x1x2xf32>
    tpu.vector_store %arg7[%c0_16, %c0_17, %c0_18], %36 {strides = array<i32>} : memref<1x1x2xf32, #tpu.memory_space<vmem>>, vector<1x1x2xf32>,
    return
  }
  func.func @transform_0(%arg0: i32) -> (i32, i32, i32) {
    %c0_i32 = arith.constant 0 : i32
    %c0_i32_0 = arith.constant 0 : i32
    %c0_i32_1 = arith.constant 0 : i32
    return %arg0, %c0_i32, %c0_i32_0 : i32, i32, i32
  }
  func.func @transform_1(%arg0: i32) -> (i32, i32) {
    %c0_i32 = arith.constant 0 : i32
    %c0_i32_0 = arith.constant 0 : i32
    %c0_i32_1 = arith.constant 0 : i32
    return %c0_i32, %c0_i32_0 : i32, i32
  }
  func.func @transform_2(%arg0: i32) -> (i32, i32) {
    %c0_i32 = arith.constant 0 : i32
    %c0_i32_0 = arith.constant 0 : i32
    %c0_i32_1 = arith.constant 0 : i32
    return %c0_i32, %c0_i32_0 : i32, i32
  }
  func.func @transform_3(%arg0: i32) -> (i32, i32) {
    %c0_i32 = arith.constant 0 : i32
    %c0_i32_0 = arith.constant 0 : i32
    %c0_i32_1 = arith.constant 0 : i32
    return %c0_i32, %c0_i32_0 : i32, i32
  }
  func.func @transform_4(%arg0: i32) -> (i32, i32) {
    %c0_i32 = arith.constant 0 : i32
    %c0_i32_0 = arith.constant 0 : i32
    %c0_i32_1 = arith.constant 0 : i32
    return %c0_i32, %c0_i32_0 : i32, i32
  }
  func.func @transform_5(%arg0: i32) -> i32 {
    %c0_i32 = arith.constant 0 : i32
    %c0_i32_0 = arith.constant 0 : i32
    return %c0_i32 : i32
  }
  func.func @transform_6(%arg0: i32) -> (i32, i32, i32) {
    %c0_i32 = arith.constant 0 : i32
    %c0_i32_0 = arith.constant 0 : i32
    %c0_i32_1 = arith.constant 0 : i32
    return %arg0, %c0_i32, %c0_i32_0 : i32, i32, i32
  }
}

</mosaic_0001>

<bundles_post_ra>
// kernel: tpu_custom_call.1
= control target key start
LH: loop header
LB: loop body
LE: loop exit
PB: predicated region body
PF: predicated region fallthrough
CT: control target
= control target key end

     0   :  { %12 = vsyncpa [#allocation4], 0  ;;  %s643_s0 = inlined_call_operand.hbm [shape: f32[2,16,32], index: 0, kind: input, shape index: {}]   ;;  %s644_s1 = inlined_call_operand.hbm [shape: bf16[128,128], index: 1, kind: input, shape index: {}]   ;;  %s645_s2 = inlined_call_operand.vmem [shape: f32[1,128], index: 2, kind: input, shape index: {}]   ;;  %s646_s3 = inlined_call_operand.hbm [shape: f32[16,128], index: 3, kind: input, shape index: {}]   ;;  %s647_s4 = inlined_call_operand.vmem [shape: f32[1,128], index: 4, kind: input, shape index: {}]   ;;  %s648_s5 = inlined_call_operand.<no memory space> [shape: f32[1], index: 5, kind: input, shape index: {}]   ;;  %s649_s6 = inlined_call_operand.hbm [shape: f32[1,1,2], index: 6, kind: output, shape index: {}]  }
   0x1   :  { %13 = vsyncpa [#allocation7], 0 }
   0x2   :  { %14 = vsyncpa [#allocation5], 0  ;;  %s566_s21 = smov [#allocation6]  }
   0x3   :  { %s32_s22 = sshll.u32 %s566_s21, 4  ;;  %s33_s22 = int_to_ptr.vmem [resolvable:$true] %s32_s22 }
   0x4   :  { %s488_s23 = scalar_lea.vmem %s33_s22, 1024  ;;  %p493_p1 = scmp.lt.s32.totalorder %s33_s22, %s33_s22 }
   0x5   :  { %p489_p0 = scmp.ne.s32.totalorder %s33_s22, %s488_s23  ;;  %p494_p2 = scmp.lt.s32.totalorder %s488_s23, %s488_s23 }
   0x7   :  { %p495_p3 = por %p494_p2, %p493_p1 }
   0x9   :  { %p496_p4 = pnand %p495_p3, %p489_p0 }
   0xb   :  { %499 = shalt.err (!%p496_p4)
}
   0xc   :  { %s567_s24 = smov 64   ;;  %s568_s25 = smov 4  }
   0xd   :  { %38 = dma.hbm_to_vmem [thread:$0]  %s644_s1, 1024, %s33_s22, [#allocation7], %s567_s24, %s567_s24, %s568_s25  }
   0xe   :  { %s569_s28 = smov [#allocation3]  }
   0xf   :  { %s20_s29 = sshll.u32 %s569_s28, 4  ;;  %s21_s29 = int_to_ptr.vmem [resolvable:$true] %s20_s29 }
  0x10   :  { %s508_s30 = scalar_lea.vmem %s21_s29, 512  ;;  %p513_p6 = scmp.lt.s32.totalorder %s21_s29, %s21_s29 }
  0x11   :  { %p509_p5 = scmp.ne.s32.totalorder %s21_s29, %s508_s30  ;;  %p514_p7 = scmp.lt.s32.totalorder %s508_s30, %s508_s30 }
  0x13   :  { %p515_p8 = por %p514_p7, %p513_p6 }
  0x15   :  { %p516_p9 = pnand %p515_p8, %p509_p5 }
  0x17   :  { %519 = shalt.err (!%p516_p9)
}
  0x18   :  { %s570_s7 = smov 128   ;;  %s571_s8 = smov 8  }
  0x19   :  { %26 = dma.hbm_to_vmem [thread:$0]  %s643_s0, 512, %s21_s29, [#allocation4], %s570_s7, %s570_s7, %s571_s8  }
  0x1a   :  { %s572_s11 = smov [#allocation8]  }
  0x1b   :  { %s46_s12 = sshll.u32 %s572_s11, 4  ;;  %s47_s12 = int_to_ptr.vmem [resolvable:$true] %s46_s12 }
  0x1c   :  { %s528_s1 = scalar_lea.vmem %s47_s12, 256  ;;  %p533_p11 = scmp.lt.s32.totalorder %s47_s12, %s47_s12 }
  0x1d   :  { %p529_p10 = scmp.ne.s32.totalorder %s47_s12, %s528_s1  ;;  %p534_p12 = scmp.lt.s32.totalorder %s528_s1, %s528_s1 }
  0x1f   :  { %p535_p13 = por %p534_p12, %p533_p11 }
  0x21   :  { %p536_p0 = pnand %p535_p13, %p529_p10 }
  0x23   :  { %539 = shalt.err (!%p536_p0)
}
  0x24   :  { %52 = dma.hbm_to_vmem [thread:$0]  %s646_s3, 256, %s47_s12, [#allocation7], %s570_s7, %s570_s7, %s571_s8  }
  0x25   :  { %560 = dma.done.wait [#allocation4], 512  }
  0x26   :  { %561 = vsyncadd [#allocation4], 4294966784 }
  0x27   :  { %562 = dma.done.wait [#allocation7], 1280  }
  0x28   :  { %563 = vsyncadd [#allocation7], 4294966016  ;;  %v67_v0 = vld [vmem:[#allocation3] sm:$0xff]  ;;  %v68_v1 = vld [vmem:[#allocation3 + $0x8] sm:$0xff]  ;;  %v573_v13 = vmov 0   ;;  %vm105_vm0 = vcmask 1046528  }
  0x29   :  { %v69_v2 = vld [vmem:[#allocation3 + $0x10] sm:$0xff]  ;;  %468 = vtanh.f32 %v67_v0  ;;  %v70_v3 = vld [vmem:[#allocation3 + $0x18] sm:$0xff]  ;;  %v462_v6 = vld [vmem:[#allocation6 + $0x28] sm:$0xff]   ;;  %v88_v14 = vrot.slane %v573_v13, 1  ;;  %v122_v21 = vrot.slane %v573_v13, 2  ;;  %s574_s0 = smov 32  }
  0x2a   :  { %470 = vtanh.f32 %v68_v1  ;;  %v460_v4 = vld [vmem:[#allocation6 + $0x38] sm:$0xff]   ;;  %v461_v5 = vld [vmem:[#allocation6 + $0x30] sm:$0xff]   ;;  %v463_v7 = vld [vmem:[#allocation6 + $0x20] sm:$0xff]   ;;  %vm77_vm1 = vsmask.f32 7424  ;;  %s575_s3 = smov 96  }
  0x2b   :  { %472 = vtanh.f32 %v69_v2  ;;  %422 = vmatprep.subr.bf16.mxu0 %v460_v4  ;;  %v464_v9 = vld [vmem:[#allocation6 + $0x18] sm:$0xff]   ;;  %v465_v20 = vld [vmem:[#allocation6 + $0x10] sm:$0xff]   ;;  %v123_v33 = vor.u32 %v122_v21, %v88_v14  ;;  %v466_v35 = vld [vmem:[#allocation6 + $0x8] sm:$0xff]   ;;  %vm115_vm2 = vsmask.f32 6400  ;;  %vm133_vm3 = vcmask 261120  }
  0x2c   :  { %474 = vtanh.f32 %v70_v3  ;;  %423 = vmatpush3.bf16.msra.mxu0 %v460_v4  ;;  %v467_v42 = vld [vmem:[#allocation6] sm:$0xff]   ;;  %vm138_vm4 = vcmask 523264   ;;  %vm143_vm5 = vcmask 785408   ;;  %v576_v56 = vmov 0.0   ;;  %v279_v2 = vld [vmem:[#allocation8 + $0x8] sm:$0xff]  ;;  %s578_s20 = smov [#allocation9]  }
  0x2d   :  { %424 = vmatprep.subr.bf16.mxu0 %v461_v5  ;;  %442 = vmatprep.subr.mxu1 %v576_v56  ;;  %vm577_vm6 = vmmov 0   ;;  %v408_v57 = vld [vmem:[%s645_s2] ss:$0 sm:$0xff]  ;;  %vm303_vm7 = vcmask 1041409   ;;  %s390_s21 = sshll.u32 %s578_s20, 4  ;;  %vm382_vm8 = vcmask 8192   ;;  %s391_s21 = int_to_ptr.vmem [resolvable:$true] %s390_s21 }
  0x2e   :  { %444 = vmatprep.mubr.msk.f32.mxu1 %vm577_vm6, %v576_v56  ;;  %v278_v1 = vld [vmem:[#allocation8] sm:$0xff]  ;;  %s544_s22 = scalar_lea.vmem %s391_s21, 32  ;;  %p545_p2 = scmp.lt.s32.totalorder %s391_s21, %s391_s21 }
  0x30   :  { %425 = vmatpush3.bf16.msra.mxu0 %v461_v5 }
  0x31   :  { %426 = vmatprep.subr.bf16.mxu0 %v462_v6 }
  0x34   :  { %427 = vmatpush3.bf16.msra.mxu0 %v462_v6 }
  0x35   :  { %428 = vmatprep.subr.bf16.mxu0 %v463_v7 }
  0x36   :  { %v469_v8 = vpop.eup %468 }
  0x37   :  { %v471_v10 = vpop.eup %470 }
  0x38   :  { %v473_v11 = vpop.eup %472  ;;  %v75_v12 = vpack.c.bf16 %v471_v10, %v469_v8  ;;  %429 = vmatpush3.bf16.msra.mxu0 %v463_v7 }
  0x39   :  { %v475_v15 = vpop.eup %474  ;;  %430 = vmatprep.subr.bf16.mxu0 %v464_v9 }
  0x3a   :  { %v106_v16 = vrot.slane %v75_v12, 1  ;;  %v79_v17 = vshrl.u32 %v75_v12, 16  ;;  %v81_v18 = vshll.u32 %v75_v12, 16  ;;  %v76_v19 = vpack.c.bf16 %v475_v15, %v473_v11 }
  0x3c   :  { %v108_v22 = vsel %vm105_vm0, %v106_v16, %v88_v14  ;;  %v83_v23 = vrot.slane %v81_v18, 1  ;;  %v109_v24 = vrot.slane %v76_v19, 1  ;;  %v91_v25 = vshrl.u32 %v76_v19, 16  ;;  %431 = vmatpush3.bf16.msra.mxu0 %v464_v9 }
  0x3d   :  { %111 = vrot.lane.b32.xlu1 %v108_v22, %s567_s24  ;;  %v93_v26 = vshll.u32 %v76_v19, 16  ;;  %v116_v27 = vrot.slane %v79_v17, 1  ;;  %v117_v31 = vrot.slane %v81_v18, 2  ;;  %432 = vmatprep.subr.bf16.mxu0 %v465_v20 }
  0x3e   :  { %v84_v28 = vor.u32 %v83_v23, %v79_v17  ;;  %v110_v29 = vsel %vm105_vm0, %v109_v24, %v88_v14  ;;  %v125_v30 = vrot.slane %v91_v25, 1 }
  0x3f   :  { %v95_v32 = vrot.slane %v93_v26, 1  ;;  %v126_v34 = vrot.slane %v93_v26, 2  ;;  %v118_v39 = vor.u32 %v117_v31, %v116_v27  ;;  %v298_v27 = vld [vmem:[%s647_s4] sm:$0x1]  ;;  %s540_s4 = scalar_lea.vmem %s391_s21, 16 }
  0x40   :  { %v89_v36 = vsel %vm77_vm1, %v84_v28, %v88_v14  ;;  %433 = vmatpush3.bf16.msra.mxu0 %v465_v20  ;;  %v300_v28 = vstv %s648_s5  ;;  %p541_p1 = scmp.ne.s32.totalorder %s391_s21, %s540_s4  ;;  %p546_p3 = scmp.lt.s32.totalorder %s544_s22, %s540_s4 }
  0x41   :  { %98 = vrot.lane.b32.xlu0 %v89_v36, %s574_s0  ;;  %113 = vrot.lane.b32.xlu1 %v110_v29, %s567_s24  ;;  %v96_v37 = vor.u32 %v95_v32, %v91_v25  ;;  %v127_v38 = vor.u32 %v126_v34, %v125_v30  ;;  %v124_v43 = vsel %vm115_vm2, %v118_v39, %v123_v33 }
  0x42   :  { %434 = vmatprep.subr.bf16.mxu0 %v466_v35  ;;  %p547_p4 = por %p546_p3, %p545_p2 }
  0x43   :  { %v97_v40 = vsel %vm77_vm1, %v96_v37, %v88_v14  ;;  %v128_v41 = vsel %vm115_vm2, %v127_v38, %v123_v33 }
  0x44   :  { %435 = vmatpush3.bf16.msra.mxu0 %v466_v35  ;;  %p548_p5 = pnand %p547_p4, %p541_p1 }
  0x45   :  { %100 = vrot.lane.b32.xlu0 %v97_v40, %s574_s0  ;;  %131 = vrot.lane.b32.xlu1 %v128_v41, %s575_s3 }
  0x46   :  { %436 = vmatprep.subr.bf16.mxu0 %v467_v42 }
  0x48   :  { %437 = vmatpush3.bf16.msra.mxu0 %v467_v42 }
  0x49   :  { %129 = vrot.lane.b32.xlu0 %v124_v43, %s575_s3 }
  0xaf   :  { %v112_v44 = vpop.permute.xlu1 %111 }
  0xb3   :  { %v99_v45 = vpop.permute.xlu0 %98  ;;  %v114_v46 = vpop.permute.xlu1 %113 }
  0xb4   :  { %v135_v48 = vsel %vm133_vm3, %v75_v12, %v99_v45 }
  0xb5   :  { %v140_v53 = vsel %vm138_vm4, %v135_v48, %v112_v44 }
  0xb7   :  { %v101_v47 = vpop.permute.xlu0 %100  ;;  %v132_v50 = vpop.permute.xlu1 %131 }
  0xb8   :  { %v137_v49 = vsel %vm133_vm3, %v76_v19, %v101_v47 }
  0xb9   :  { %v142_v51 = vsel %vm138_vm4, %v137_v49, %v114_v46 }
  0xba   :  { %v148_v55 = vsel %vm143_vm5, %v142_v51, %v132_v50 }
  0xbb   :  { %v130_v52 = vpop.permute.xlu0 %129 }
  0xbc   :  { %v145_v54 = vsel %vm143_vm5, %v140_v53, %v130_v52 }
  0xbd   :  { %438 = vmatprep.mubr.bf16.mxu0 %v145_v54 }
  0xbe   :  { %439 = vmatmul.mubr.bf16.vlgmr.msra.gmra.mxu0 %v148_v55 }
 0x17e   :  { %v440_v58 = vpop.f32.mrf.mxu0 }
 0x17f   :  { %v272_v59 = vadd.f32 %v440_v58, %v408_v57 }
 0x180   :  { %v248_v60 = vpop.f32.mrf.mxu0 }
 0x181   :  { %v270_v61 = vadd.f32 %v408_v57, %v248_v60  ;;  %v276_v63 = vmax.f32 %v272_v59, 0.0 }
 0x182   :  { %v441_v62 = vpop.f32.mrf.mxu0 }
 0x183   :  { %v273_v0 = vadd.f32 %v441_v62, %v408_v57  ;;  %v274_v4 = vmax.f32 %v270_v61, 0.0  ;;  %v282_v7 = vmul.f32 %v278_v1, %v276_v63 }
 0x184   :  { %v251_v3 = vpop.f32.mrf.mxu0 }
 0x185   :  { %v277_v5 = vmax.f32 %v273_v0, 0.0  ;;  %v271_v6 = vadd.f32 %v408_v57, %v251_v3  ;;  %v280_v10 = vmul.f32 %v278_v1, %v274_v4 }
 0x187   :  { %v283_v8 = vmul.f32 %v279_v2, %v277_v5  ;;  %v275_v9 = vmax.f32 %v271_v6, 0.0 }
 0x189   :  { %v291_v11 = vmax.f32 %v282_v7, %v283_v8  ;;  %v281_v12 = vmul.f32 %v279_v2, %v275_v9 }
 0x18b   :  { %v292_v13 = vrot.slane %v291_v11, 4  ;;  %v284_v14 = vmax.f32 %v280_v10, %v281_v12 }
 0x18d   :  { %v293_v15 = vmax.f32 %v291_v11, %v292_v13  ;;  %v285_v16 = vrot.slane %v284_v14, 4 }
 0x18f   :  { %v286_v17 = vmax.f32 %v284_v14, %v285_v16  ;;  %v294_v18 = vrot.slane %v293_v15, 2 }
 0x191   :  { %v287_v19 = vrot.slane %v286_v17, 2  ;;  %v295_v20 = vmax.f32 %v293_v15, %v294_v18 }
 0x193   :  { %v288_v21 = vmax.f32 %v286_v17, %v287_v19  ;;  %v296_v22 = vrot.slane %v295_v20, 1 }
 0x195   :  { %v289_v23 = vrot.slane %v288_v21, 1  ;;  %v297_v25 = vmax.f32 %v295_v20, %v296_v22 }
 0x197   :  { %v290_v24 = vmax.f32 %v288_v21, %v289_v23 }
 0x199   :  { %v304_v26 = vsel %vm303_vm7, %v297_v25, %v290_v24 }
 0x19a   :  { %443 = vmatpush3.xpose.msra.mxu1 %v304_v26 }
 0x19d   :  { %445 = vmatmul.mubr.f32.vlgmr.msra.gmra.mxu1 %v298_v27 }
 0x25d   :  { %v372_v29 = vpop.f32.mrf.mxu1 }
 0x25e   :  { %v373_v30 = vadd.f32 %v372_v29, %v300_v28 }
 0x25f   :  { %v446_v31 = vpop.f32.mrf.mxu1 }
 0x260   :  { %v409_v32 = vmul.f32 -1.442695, %v373_v30 }
 0x262   :  { %476 = vpow2.f32 %v409_v32 }
 0x26f   :  { %v477_v33 = vpop.eup %476 }
 0x270   :  { %v379_v34 = vadd.f32 1.0, %v477_v33 }
 0x272   :  { %478 = vrcp.f32 %v379_v34 }
 0x27f   :  { %v479_v35 = vpop.eup %478 }
 0x280   :  { %383 = vst.msk [vmem:[#allocation9] sm:$0x1] %vm382_vm8, %v479_v35 }
 0x281   :  { %551 = shalt.err (!%p548_p5)
}
 0x282   :  { %393 = dma.vmem_to_hbm [thread:$0]  %s391_s21, 16, %s649_s6, [#allocation5]  }
 0x283   :  { %564 = dma.done.wait [#allocation5], 16  }
 0x284   :  { %565 = vsyncadd [#allocation5], 4294967280 }
 0x285   :  { %397 = vsyncpa [#allocation4], 1 }
 0x286   :  { %398 = vsyncpa [#allocation7], 1 }
 0x287   :  { %399 = vsyncpa [#allocation5], 1 }

</bundles_post_ra>
